<compile_context>
chip_gen: v6e
topology: v6e:2x2x1
jax: 0.10.0
libtpu: 0.0.40
codegen_flags: <defaults>
</compile_context>

<pallas_src>
import functools

import jax
import jax.numpy as jnp
from jax.experimental import pallas as pl
from jax.experimental.pallas import tpu as pltpu


def _miu_kernel(x_ref, c_ref, o_ref, *, compare_positive):
    """Elementwise Miu predicate on one (TILE_ROWS, TILE_T) block.

    x_ref: (TILE_ROWS, TILE_T)  signal block (rows = flattened batch*num_sig)
    c_ref: (TILE_ROWS, 1)       per-row threshold (already broadcast to rows)
    o_ref: (TILE_ROWS, TILE_T)  output block (same lane-dense layout as x)
    """
    x = x_ref[...]
    c = jnp.maximum(c_ref[...], 0.0)      # clamp(c, min=0.0); broadcasts over lanes
    if compare_positive:                  # `compare` is a static Python flag
        o_ref[...] = x - c
    else:
        o_ref[...] = c - x


def _round_up(v, m):
    return -(-v // m) * m


def _choose_tiles(rows, t, dtype_bytes, max_block_bytes=4 << 20):
    """Pick (tile_rows, tile_t) for a row-major (rows, t) array.

    Preference order (memory-bound elementwise op => DMA shape is everything):
      1. keep the full T axis per block so each block is one contiguous DMA and
         stores stay lane-dense/unmasked; shrink rows (multiples of 8) first,
      2. only tile T (multiples of 128) if a minimum-height block still blows
         the budget,
      3. force at least two blocks so both v7x TensorCores get work.
    VMEM accounting uses the (8, 128)-padded footprint of a block; with 4 MiB
    blocks and double-buffered x + out this stays well under the 32 MiB scoped
    limit on every generation.
    """
    row_bytes = _round_up(t, 128) * dtype_bytes          # one padded block row

    # 1. Largest row tile (multiple of 8, or the whole array) with full T.
    max_rows_fit = max_block_bytes // row_bytes
    if rows <= max_rows_fit:
        tile_rows = rows
    elif max_rows_fit >= 8:
        tile_rows = 8 * (max_rows_fit // 8)
    else:
        tile_rows = min(rows, 8)

    # 2. Fallback: tile T, keeping lane-dense multiples of 128.
    tile_t = t
    if (_round_up(tile_rows, 8) * row_bytes > max_block_bytes
            and t % 128 == 0 and t > 128):
        lanes = max(1, max_block_bytes
                    // (_round_up(tile_rows, 8) * 128 * dtype_bytes))
        tile_t = min(t, 128 * lanes)

    # 3. Megacore: guarantee >= 2 parallel blocks when the data is splittable.
    if pl.cdiv(rows, tile_rows) * pl.cdiv(t, tile_t) < 2:
        if rows >= 16:
            tile_rows = _round_up((rows + 1) // 2, 8)
        elif tile_t % 256 == 0:
            tile_t //= 2

    return tile_rows, tile_t


def miu_forward(x, c, *, compare):
    """Pallas wrapper mirroring Miu.forward.

    x:       (N, num_sig, T) float32 signal  (a 2-D (num_sig, T) input is also accepted)
    c:       (num_sig, 1)    float32 parameter
    compare: static Python number; >0 -> x - clamp(c), else clamp(c) - x
    """
    squeeze_batch = x.ndim == 2
    if squeeze_batch:
        x = x[None]
    n, s, t = x.shape
    assert c.shape == (s, 1), f"c must be ({s}, 1), got {c.shape}"

    rows = n * s
    x2 = x.reshape(rows, t)                                   # free: contiguous view
    c_rows = jnp.broadcast_to(c[None], (n, s, 1)).reshape(rows, 1)  # tiny

    dtype_bytes = jnp.dtype(x.dtype).itemsize
    tile_rows, tile_t = _choose_tiles(rows, t, dtype_bytes)
    grid = (pl.cdiv(rows, tile_rows), pl.cdiv(t, tile_t))

    kernel = functools.partial(_miu_kernel, compare_positive=(compare > 0))

    out2 = pl.pallas_call(
        kernel,
        out_shape=jax.ShapeDtypeStruct((rows, t), x.dtype),
        grid=grid,
        in_specs=[
            pl.BlockSpec((tile_rows, tile_t), lambda i, j: (i, j)),
            pl.BlockSpec((tile_rows, 1), lambda i, j: (i, 0)),
        ],
        out_specs=pl.BlockSpec((tile_rows, tile_t), lambda i, j: (i, j)),
        compiler_params=pltpu.CompilerParams(
            dimension_semantics=("parallel", "parallel"),
            vmem_limit_bytes=32 * 1024 * 1024,
        ),
        cost_estimate=pl.CostEstimate(
            flops=rows * t,               # one subtract per element (memory-bound)
            transcendentals=0,
            bytes_accessed=2 * rows * t * dtype_bytes + rows * dtype_bytes,
        ),
    )(x2, c_rows)

    out = out2.reshape(n, s, t)
    return out[0] if squeeze_batch else out


def _reference(x, c, compare):
    """Pure-JAX reference of the PyTorch forward (for a correctness check)."""
    c_cl = jnp.maximum(c, 0.0)
    return x - c_cl if compare > 0 else c_cl - x


if __name__ == "__main__":
    # Small deterministic example consistent with the module's forward:
    # x broadcasts against the (num_sig, 1) parameter over batch and time.
    N, num_sig, T = 2, 4, 256

    key = jax.random.PRNGKey(0)
    kx, kc = jax.random.split(key)
    x = jax.random.normal(kx, (N, num_sig, T), dtype=jnp.float32)
    # nn.Parameter(torch.randn(num_sig, 1)) — includes negatives, exercising clamp.
    c = jax.random.normal(kc, (num_sig, 1), dtype=jnp.float32)

    for compare in (1, -1):
        out = jax.block_until_ready(miu_forward(x, c, compare=compare))
        ref = _reference(x, c, compare)
        assert out.shape == ref.shape
        assert jnp.allclose(out, ref, atol=1e-6, rtol=1e-6), "mismatch vs reference"

    print("KERNEL_OK")
</pallas_src>

<mosaic_0001>
module attributes {stable_mosaic.version = 11 : i64} {
  func.func @_miu_kernel(%arg0: i32, %arg1: i32, %arg2: memref<8x128xf32, #tpu.memory_space<vmem>>, %arg3: memref<8x1xf32, #tpu.memory_space<vmem>>, %arg4: memref<8x128xf32, #tpu.memory_space<vmem>>) attributes {dimension_semantics = [#tpu.dimension_semantics<parallel>, #tpu.dimension_semantics<parallel>], iteration_bounds = array<i64: 1, 2>, scalar_prefetch = 0 : i64, scratch_operands = 0 : i64, tpu.core_type = #tpu.core_type<tc>, window_params = [{transform_indices = @transform_0, window_bounds = array<i64: 8, 128>}, {transform_indices = @transform_1, window_bounds = array<i64: 8, 1>}, {transform_indices = @transform_2, window_bounds = array<i64: 8, 128>}]} {
    %c0 = arith.constant 0 : index
    %c0_0 = arith.constant 0 : index
    %0 = vector.load %arg2[%c0, %c0_0] : memref<8x128xf32, #tpu.memory_space<vmem>>, vector<8x128xf32>
    %c0_1 = arith.constant 0 : index
    %c0_2 = arith.constant 0 : index
    %1 = vector.load %arg3[%c0_1, %c0_2] : memref<8x1xf32, #tpu.memory_space<vmem>>, vector<8x1xf32>
    %cst = arith.constant 0.000000e+00 : f32
    %2 = vector.broadcast %cst : f32 to vector<8x1xf32>
    %3 = arith.maximumf %1, %2 : vector<8x1xf32>
    %4 = vector.broadcast %3 : vector<8x1xf32> to vector<8x128xf32>
    %5 = arith.subf %0, %4 : vector<8x128xf32>
    %c0_3 = arith.constant 0 : index
    %c0_4 = arith.constant 0 : index
    %6 = vector.load %arg4[%c0_3, %c0_4] : memref<8x128xf32, #tpu.memory_space<vmem>>, vector<8x128xf32>
    tpu.vector_store %arg4[%c0_3, %c0_4], %5 {strides = array<i32>} : memref<8x128xf32, #tpu.memory_space<vmem>>, vector<8x128xf32>,
    return
  }
  func.func @transform_0(%arg0: i32, %arg1: i32) -> (i32, i32) {
    %c0_i32 = arith.constant 0 : i32
    return %arg0, %arg1 : i32, i32
  }
  func.func @transform_1(%arg0: i32, %arg1: i32) -> (i32, i32) {
    %c0_i32 = arith.constant 0 : i32
    %c0_i32_0 = arith.constant 0 : i32
    return %arg0, %c0_i32 : i32, i32
  }
  func.func @transform_2(%arg0: i32, %arg1: i32) -> (i32, i32) {
    %c0_i32 = arith.constant 0 : i32
    return %arg0, %arg1 : i32, i32
  }
}

</mosaic_0001>

<bundles_post_ra>
// kernel: tpu_custom_call.1
= control target key start
LH: loop header
LB: loop body
LE: loop exit
PB: predicated region body
PF: predicated region fallthrough
CT: control target
= control target key end

     0   :  { %7 = vsyncpa [#allocation3], 0  ;;  %s660_s0 = inlined_call_operand.hbm [shape: f32[8,256], index: 0, kind: input, shape index: {}]   ;;  %s661_s1 = inlined_call_operand.vmem [shape: f32[8,1], index: 1, kind: input, shape index: {}]   ;;  %s662_s2 = inlined_call_operand.hbm [shape: f32[8,256], index: 2, kind: output, shape index: {}]  }
   0x1   :  { %9 = vsyncpa [#allocation3 + $0x1], 0 }
   0x2   :  { %10 = vsyncpa [#allocation4], 0 }
   0x3   :  { %12 = vsyncpa [#allocation4 + $0x1], 0  ;;  %s523_s9 = smov 0   ;;  %s525_s10 = smov 0  }
   0x4   :  { %s527_s11 = smov 0   ;;  %s529_s12 = smov 0  }
   0x5   :  { %s531_s13 = smov 0   ;;  %s533_s14 = smov 0  }
   0x6 LB: > { %s317_s15 = sadd.s32 4294967295, %s503_s14   ;;  %s318_s16 = sadd.s32 4294967294, %s503_s14   ;;  %s503_s14 = sphi %s533_s14, %s18_s14   ;;  %s499_s13 = sphi %s531_s13, %s674_s13   ;;  %s495_s12 = sphi %s529_s12, %s673_s12   ;;  %s491_s11 = sphi %s527_s11, %s672_s11   ;;  %s487_s10 = sphi %s525_s10, %s671_s10   ;;  %s483_s9 = sphi %s523_s9, %s670_s9  }
   0x7   : > { %s27_s17 = sadd.s32 1, %s499_s13  ;;  %s39_s18 = sadd.s32 1, %s491_s11 }
   0x8   : > { %p28_p0 = scmp.ge.s32.totalorder %s27_s17, 2  ;;  %p46_p1 = scmp.ne.s32.totalorder %s491_s11, %s487_s10 }
   0x9   : > { %p47_p2 = scmp.eq.s32.totalorder %s503_s14, 0  ;;  %p52_p3 = scmp.ne.s32.totalorder %s487_s10, %s483_s9 }
   0xa   : > { %s676_s17 = smov (%p28_p0, %s27_s17), 0  ;;  %p53_p5 = scmp.eq.s32.totalorder %s317_s15, 0 }
   0xb   : > { %p564_p4 = por %p47_p2, %p46_p1  ;;  %s35_s20 = ssub.s32 %s499_s13, %s676_s17 }
   0xc   : > { %p104_p6 = scmp.eq.s32.totalorder %s317_s15, 1  ;;  %p37_p7 = scmp.eq.s32.totalorder %s35_s20, 0 }
   0xd   : > { %p570_p8 = por %p53_p5, %p52_p3  ;;  %p110_p10 = scmp.eq.s32.totalorder %s318_s16, 1 }
   0xe   : > { %p574_p9 = por %p104_p6, %p46_p1  ;;  %p343_p13 = scmp.lt.s32.totalorder %s503_s14, 2 }
   0xf   : > { %s579_s23 = scalar_select %p37_p7, %s491_s11, %s39_s18  }
  0x10   : > { %p581_p11 = por %p110_p10, %p52_p3  ;;  %s137_s25 = sand.u32 1, %s491_s11  }
  0x11   : > { %s322_s26 = sshll.u32 %s137_s25, 3  ;;  %s323_s27 = sshll.u32 %s499_s13, 7 }
  0x12   : > { %s666_s24 = scalar_select %p581_p11, 1, 0 }
  0x13   : > { %s148_s30 = scalar_lea.hbm %s660_s0, %s323_s27  ;;  %s141_s3 = scalar_lea.vmem [#allocation2], %s322_s26 }
  0x14   : > { %s150_s4 = sshll.u32 %s141_s3, 4  ;;  %p594_p0 = pnand %p343_p13, %p564_p4  ;;  %s151_s4 = int_to_ptr.vmem [resolvable:$true] %s150_s4 }
  0x15   : > { %p324_p1 = scmp.ge.s32.totalorder %s503_s14, 1  ;;  %p155_p2 = scmp.lt.s32.totalorder %s503_s14, 3 }
  0x16   : > { %s138_s6 = scalar_lea.sflag [#allocation3], %s137_s25  ;;  %p397_p3 = pneg %p594_p0 }
  0x17   : > { %s408_s7 = scalar_lea.vmem %s151_s4, 128  ;;  %s505_s8 = smov [#allocation2]  }
  0x18   : > { %p409_p5 = scmp.ne.s32.totalorder %s151_s4, %s408_s7  ;;  %s413_s15 = sshll.u32 %s505_s8, 4  ;;  %s414_s15 = int_to_ptr.vmem [resolvable:$false] %s413_s15 }
  0x19   : > { %s415_s16 = scalar_lea.vmem %s414_s15, 256  ;;  %p416_p10 = scmp.lt.s32.totalorder %s151_s4, %s414_s15 }
  0x1a   : > { %p411_p6 = pnand %p409_p5, %p397_p3  ;;  %p417_p12 = scmp.lt.s32.totalorder %s415_s16, %s408_s7 }
  0x1c   : > { %p412_p7 = pneg %p411_p6  ;;  %p418_p4 = por %p417_p12, %p416_p10 }
  0x1e   : > { %p419_p13 = pnand %p418_p4, %p412_p7 }
  0x20   : > { %422 = shalt.err (!%p419_p13)
}
  0x21   : > { %338 = dma.hbm_to_vmem [thread:$0]  (!%p594_p0), %s148_s30, 128, %s151_s4, %s138_s6  }
  0x22   : > { %p156_p11 = pnand %p324_p1, %p155_p2 }
  0x23   : > { %s609_s18 = sand.u32 (!%p156_p11), 1, %s487_s10  }
  0x24   : > { %159 = sbr.rel (%p156_p11) target bundleno = 184 (0xb8), region = 28  ;;  %s325_s19 = sshll.u32 (!%p156_p11), %s609_s18, 3 }
  0x25   : > { %s162_s20 = scalar_lea.sflag (!%p156_p11), [#allocation3], %s609_s18  ;;  %s165_s25 = scalar_lea.vmem (!%p156_p11), [#allocation2], %s325_s19 }
  0x29   : > { %474 = dma.done.wait (%p570_p8), %s162_s20, 128  }
  0x2a   : > { %476 = vsyncadd (%p570_p8), %s162_s20, 4294967168  ;;  %v506_v0 = vmov 0   ;;  %v195_v1 = vld [vmem:[%s661_s1] sm:$0xff]  ;;  %s328_s28 = sshll.u32 %s495_s12, 7  ;;  %s189_s29 = scalar_lea.vmem [#allocation5], %s325_s19 }
  0x2b   : > { %394 = vset.pattern.permute.xlu0 %v506_v0  ;;  %v196_v2 = vmax.f32 %v195_v1, 0.0  ;;  %v194_v3 = vld [vmem:[%s165_s25] sm:$0xff]  ;;  %s220_s30 = sshll.u32 %s189_s29, 4  ;;  %s218_s4 = scalar_lea.hbm %s662_s2, %s328_s28  ;;  %s221_s30 = int_to_ptr.vmem [resolvable:$true] %s220_s30 }
  0x2c   : > { %s205_s5 = scalar_lea.sflag [#allocation4], %s609_s18  ;;  %s423_s6 = scalar_lea.vmem %s221_s30, 128 }
  0x2d   : > { %199 = vperm.xlu0 %394, %v196_v2   ;;  %p424_p8 = scmp.ne.s32.totalorder %s221_s30, %s423_s6  ;;  %s507_s7 = smov [#allocation5]  }
  0x2e   : > { %s427_s8 = sshll.u32 %s507_s7, 4  ;;  %s428_s8 = int_to_ptr.vmem [resolvable:$false] %s427_s8 }
  0x2f   : > { %p425_p11 = pnand %p424_p8, %p574_p9  ;;  %s429_s12 = scalar_lea.vmem %s428_s8, 256 }
  0x30   : > { %p430_p0 = scmp.lt.s32.totalorder %s221_s30, %s428_s8  ;;  %p431_p1 = scmp.lt.s32.totalorder %s429_s12, %s423_s6 }
  0x31   : > { %p426_p12 = pneg %p425_p11 }
  0x32   : > { %p432_p2 = por %p431_p1, %p430_p0 }
  0x34   : > { %p433_p3 = pnand %p432_p2, %p426_p12 }
  0xa8   : > { %v200_v4 = vpop.permute.xlu0 %199 }
  0xa9   : > { %v202_v5 = vsub.f32 %v194_v3, %v200_v4 }
  0xab   : > { %203 = vst [vmem:[%s189_s29] sm:$0xff] %v202_v5 }
  0xac   : > { %436 = shalt.err (!%p433_p3)
}
  0xad   : > { %s437_s15 = scalar_lea.hbm %s218_s4, 128  ;;  %s441_s19 = scalar_lea.hbm %s662_s2, 256 }
  0xae   : > { %p438_p5 = scmp.ne.s32.totalorder %s218_s4, %s437_s15  ;;  %p442_p10 = scmp.lt.s32.totalorder %s218_s4, %s662_s2 }
  0xaf   : > { %p443_p4 = scmp.lt.s32.totalorder %s441_s19, %s437_s15 }
  0xb0   : > { %p439_p6 = pnand %p438_p5, %p574_p9 }
  0xb1   : > { %p444_p13 = por %p443_p4, %p442_p10 }
  0xb2   : > { %p440_p7 = pneg %p439_p6 }
  0xb4   : > { %p445_p8 = pnand %p444_p13, %p440_p7 }
  0xb6   : > { %448 = shalt.err (!%p445_p8)
}
  0xb7   : > { %333 = dma.vmem_to_hbm [thread:$0]  (%p574_p9), %s221_s30, 128, %s218_s4, %s205_s5  }
  0xb8 PF: > { %s232_s26 = sand.u32 1, %s483_s9   ;;  %p668_p11 = scmp.ne.s32.totalorder %s666_s24, 0 }
  0xb9   : > { %p669_p12 = scmp.ge.s32.totalorder %s503_s14, 2  ;;  %s233_s27 = scalar_lea.sflag [#allocation4], %s232_s26 }
  0xbb   : > { %p340_p0 = pnand %p669_p12, %p668_p11 }
  0xbd   : > { %p341_p1 = pneg %p340_p0 }
  0xbf   : > { %478 = dma.done.wait (%p341_p1), %s233_s27, 128  }
  0xc0   : > { %480 = vsyncadd (%p341_p1), %s233_s27, 4294967168  ;;  %s18_s14 = sadd.s32 1, %s503_s14   ;;  %s670_s9 = smov %s487_s10 }
  0xc1   : > { %p15_p2 = scmp.ge.s32.totalorder %s18_s14, 4   ;;  %s671_s10 = smov %s491_s11 }
  0xc2   : > { %s672_s11 = smov %s579_s23  ;;  %s673_s12 = smov %s499_s13 }
  0xc3   : > { %s674_s13 = smov %s676_s17  ;;  %17 = sbr.rel (!%p15_p2) target bundleno = 6 (0x6), region = 76 }
  0xc8   :  { %238 = vsyncpa [#allocation3], 1 }
  0xc9   :  { %240 = vsyncpa [#allocation3 + $0x1], 1 }
  0xca   :  { %241 = vsyncpa [#allocation4], 1 }
  0xcb   :  { %243 = vsyncpa [#allocation4 + $0x1], 1 }

</bundles_post_ra>
